<compile_context>
chip_gen: v7x
topology: tpu7x:2x2x1
jax: 0.10.0
libtpu: 0.0.40
codegen_flags: <defaults>
</compile_context>

<pallas_src>
import functools

import jax
import jax.numpy as jnp
from jax import lax
from jax.experimental import pallas as pl
from jax.experimental.pallas import tpu as pltpu


_LANES = 128
_MAX_CHUNKS_PER_TILE = 128      # static unroll bound inside one grid step
_CHUNK_ELEMS = 8 * 1024         # ~8 f32 vregs per per-chunk temporary


def _round_up(x, m):
    return ((x + m - 1) // m) * m


def _vmem_capacity_bytes():
    """Physical per-core VMEM (64 MiB on v7x, 128 MiB on v5e/v6e)."""
    try:
        info = pltpu.get_tpu_info()
        for attr in ("vmem_capacity_bytes", "vmem_bytes", "vmem_size_bytes"):
            val = getattr(info, attr, None)
            if val:
                return int(val)
    except Exception:
        pass
    return 128 * 1024 * 1024


def _accum_block(pred_ref, tgt_ref, inter_ref, union_ref, *, chunk, n_full, partial):
    """Accumulate `n_full` full chunk-wide lane slices plus an optional partial
    slice (`partial` valid lanes) of the current tile into the (rows, 128)
    accumulators.  Static slices only; each chunk's f32 temporaries die right
    after use so the live vreg set stays tiny."""
    ii = inter_ref[...]
    uu = union_ref[...]

    def one_chunk(ii, uu, lo, width, valid_lanes):
        x = pred_ref[:, lo:lo + width].astype(jnp.float32)
        t = tgt_ref[:, lo:lo + width].astype(jnp.float32)
        p = 0.5 * (jnp.tanh(0.5 * x) + 1.0)     # sigmoid: single EUP op / elem
        pt = p * t
        pu = p + t
        if valid_lanes is not None:
            lane = lax.broadcasted_iota(jnp.int32, pt.shape, 1)
            keep = lane < valid_lanes
            # Keep this a select (not a multiply): it must kill NaN/Inf coming
            # from sigmoid of the undefined padded lanes of the ragged block.
            pt = jnp.where(keep, pt, 0.0)
            pu = jnp.where(keep, pu, 0.0)
        for k in range(width // _LANES):
            sl = slice(k * _LANES, (k + 1) * _LANES)
            ii = ii + pt[:, sl]
            uu = uu + pu[:, sl]
        return ii, uu

    for c in range(n_full):
        ii, uu = one_chunk(ii, uu, c * chunk, chunk, None)
    if partial > 0:
        ii, uu = one_chunk(ii, uu, n_full * chunk,
                           _round_up(partial, _LANES), partial)

    inter_ref[...] = ii
    union_ref[...] = uu


def _dice_reduce_kernel(pred_ref, tgt_ref, inter_ref, union_ref, *,
                        ts, chunk, steps_per, s_blocks, spatial):
    i = pl.program_id(0)      # "parallel" spatial split (2nd TensorCore on v7x)
    j = pl.program_id(1)      # "arbitrary" reduction axis within the split

    @pl.when(j == 0)
    def _():
        inter_ref[...] = jnp.zeros_like(inter_ref)
        union_ref[...] = jnp.zeros_like(union_ref)

    g = i * steps_per + j                     # global spatial block index
    rem = spatial - (s_blocks - 1) * ts       # valid lanes in the final block
    ragged = rem != ts
    n_full_blocks = s_blocks - 1 if ragged else s_blocks

    if n_full_blocks > 0:
        # Fast path: full, unmasked tiles.  The guard also skips padded steps
        # past the end of the spatial range (when the 2-way split does not
        # divide the block count evenly).
        @pl.when(g < n_full_blocks)
        def _():
            _accum_block(pred_ref, tgt_ref, inter_ref, union_ref,
                         chunk=chunk, n_full=ts // chunk, partial=0)

    if ragged:
        # Masked path: only the single ragged final block pays for the mask.
        @pl.when(g == s_blocks - 1)
        def _():
            _accum_block(pred_ref, tgt_ref, inter_ref, union_ref,
                         chunk=chunk, n_full=rem // chunk, partial=rem % chunk)


@functools.partial(jax.jit, static_argnames=("smooth", "block_spatial"))
def dice_loss(pred, target, smooth=1.0, block_spatial=None):
    """Pallas implementation of DiceLoss.forward for 5-D (N, C, D, H, W) inputs."""
    assert pred.shape == target.shape and pred.ndim == 5
    N, C, D, H, W = pred.shape
    rows = N * C
    spatial = D * H * W

    # Free metadata reshapes of contiguous NCDHW tensors: no pad, no glue-side
    # dtype cast (the kernel casts + applies sigmoid in-register).
    p2 = pred.reshape(rows, spatial)
    t2 = target.reshape(rows, spatial)

    itemsize = p2.dtype.itemsize + t2.dtype.itemsize   # input bytes per lane-pair
    spatial_pad = _round_up(spatial, _LANES)

    # Lane-chunk width: bound per-chunk f32 temporaries to a few vregs.
    chunk = max(_LANES,
                min(16 * _LANES,
                    (_CHUNK_ELEMS // max(rows, 1)) // _LANES * _LANES))
    chunk = min(chunk, spatial_pad)
    if block_spatial is not None:
        req = _round_up(int(block_spatial), _LANES)
        chunk = min(chunk, req)

    # Spatial tile = as many chunks as the per-step VMEM budget allows.
    cap = _vmem_capacity_bytes()
    per_step_budget = min(16 << 20, max(2 << 20, cap // 6))   # both input blocks
    budget_chunks = max(1, per_step_budget // max(1, rows * chunk * itemsize))
    total_chunks = pl.cdiv(spatial_pad, chunk)
    ts_chunks = min(_MAX_CHUNKS_PER_TILE, budget_chunks, total_chunks)
    if block_spatial is not None:
        ts_chunks = min(ts_chunks, max(1, req // chunk))
    ts = ts_chunks * chunk
    # TODO(synk): for very large N*C (rows*128 lanes alone exceeding the budget)
    # add a row-tiling "parallel" grid axis instead of shrinking the spatial tile.

    s_blocks = pl.cdiv(spatial, ts)
    # Leading "parallel" axis: split spatial blocks across 2 TensorCores on v7x.
    n_split = 2 if s_blocks >= 2 else 1
    steps_per = pl.cdiv(s_blocks, n_split)
    grid = (n_split, steps_per)

    in_map = lambda i, j: (0, jnp.minimum(i * steps_per + j, s_blocks - 1))
    out_map = lambda i, j: (0, i)

    kernel = functools.partial(
        _dice_reduce_kernel, ts=ts, chunk=chunk, steps_per=steps_per,
        s_blocks=s_blocks, spatial=spatial)

    block_bytes = rows * ts * itemsize                 # both inputs, one buffer
    acc_bytes = 2 * 2 * rows * _LANES * 4              # 2 outputs x 2 buffers
    needed = 2 * block_bytes + acc_bytes + (2 << 20)
    vmem_limit = int(min(max(needed, 32 << 20), int(cap * 0.9)))

    inter, union = pl.pallas_call(
        kernel,
        out_shape=(
            jax.ShapeDtypeStruct((rows, n_split * _LANES), jnp.float32),
            jax.ShapeDtypeStruct((rows, n_split * _LANES), jnp.float32),
        ),
        grid_spec=pltpu.PrefetchScalarGridSpec(
            num_scalar_prefetch=0,
            grid=grid,
            in_specs=[
                # Row block == full row extent (allowed even if rows % 8 != 0),
                # spatial block lane-aligned and multi-MiB.
                pl.BlockSpec((rows, ts), in_map),
                pl.BlockSpec((rows, ts), in_map),
            ],
            out_specs=[
                # Same block across the reduction axis -> resident accumulator;
                # one 128-lane column per parallel split.
                pl.BlockSpec((rows, _LANES), out_map),
                pl.BlockSpec((rows, _LANES), out_map),
            ],
        ),
        compiler_params=pltpu.CompilerParams(
            dimension_semantics=("parallel", "arbitrary"),
            vmem_limit_bytes=vmem_limit,
        ),
    )(p2, t2)

    # Tiny finish in glue: fold lane columns + dice + mean over N*C scalars.
    inter = jnp.sum(inter, axis=-1)
    union = jnp.sum(union, axis=-1)
    dice = (2.0 * inter + smooth) / (union + smooth)
    return 1.0 - dice.mean()


def _dice_loss_ref(pred, target, smooth=1.0):
    p = jax.nn.sigmoid(pred.astype(jnp.float32))
    t = target.astype(jnp.float32)
    inter = (p * t).sum(axis=(2, 3, 4))
    union = p.sum(axis=(2, 3, 4)) + t.sum(axis=(2, 3, 4))
    dice = (2.0 * inter + smooth) / (union + smooth)
    return 1.0 - dice.mean()


if __name__ == "__main__":
    key = jax.random.PRNGKey(0)
    k1, k2, k3, k4 = jax.random.split(key, 4)

    # Case 1: spatial not a multiple of 128, single ragged block (auto tiling).
    shape1 = (2, 3, 4, 6, 13)                       # rows=6, spatial=312
    pred1 = jax.random.normal(k1, shape1, dtype=jnp.float32)
    tgt1 = (jax.random.uniform(k2, shape1) > 0.5).astype(jnp.float32)
    out1 = jax.block_until_ready(dice_loss(pred1, tgt1, smooth=1.0))
    ref1 = _dice_loss_ref(pred1, tgt1, smooth=1.0)
    assert jnp.allclose(out1, ref1, atol=1e-5, rtol=1e-5), (out1, ref1)

    # Case 2: bf16 pred in native dtype, 2-way parallel split, multi-chunk
    # tiles, ragged final block.
    shape2 = (2, 8, 8, 16, 13)                      # rows=16, spatial=1664
    pred2 = jax.random.normal(k3, shape2, dtype=jnp.bfloat16)
    tgt2 = (jax.random.uniform(k4, shape2) > 0.5).astype(jnp.float32)
    out2 = jax.block_until_ready(dice_loss(pred2, tgt2, smooth=1.0,
                                           block_spatial=1024))
    ref2 = _dice_loss_ref(pred2, tgt2, smooth=1.0)
    assert jnp.allclose(out2, ref2, atol=1e-5, rtol=1e-4), (out2, ref2)

    # Case 3: forced tiny tile -> multiple reduction steps per split, a padded
    # parallel grid step, and a garbage-lane masked tail.
    out3 = jax.block_until_ready(dice_loss(pred1, tgt1, smooth=1.0,
                                           block_spatial=128))
    assert jnp.allclose(out3, ref1, atol=1e-5, rtol=1e-5), (out3, ref1)

    print("KERNEL_OK")
</pallas_src>

<mosaic_0001>
module attributes {stable_mosaic.version = 11 : i64} {
  func.func @_dice_reduce_kernel(%arg0: i32, %arg1: i32, %arg2: memref<6x384xf32, #tpu.memory_space<vmem>>, %arg3: memref<6x384xf32, #tpu.memory_space<vmem>>, %arg4: memref<6x128xf32, #tpu.memory_space<vmem>>, %arg5: memref<6x128xf32, #tpu.memory_space<vmem>>) attributes {dimension_semantics = [#tpu.dimension_semantics<parallel>, #tpu.dimension_semantics<arbitrary>], iteration_bounds = array<i64: 1, 1>, scalar_prefetch = 0 : i64, scratch_operands = 0 : i64, tpu.core_type = #tpu.core_type<tc>, window_params = [{transform_indices = @transform_0, window_bounds = array<i64: 6, 384>}, {transform_indices = @transform_1, window_bounds = array<i64: 6, 384>}, {transform_indices = @transform_2, window_bounds = array<i64: 6, 128>}, {transform_indices = @transform_3, window_bounds = array<i64: 6, 128>}]} {
    %c0_i32 = arith.constant 0 : i32
    %0 = arith.cmpi eq, %arg1, %c0_i32 : i32
    %1 = arith.extui %0 : i1 to i32
    %c0_i32_0 = arith.constant 0 : i32
    %2 = arith.cmpi ne, %1, %c0_i32_0 : i32
    scf.if %2 {
      %cst = arith.constant 0.000000e+00 : f32
      %8 = vector.broadcast %cst : f32 to vector<6x128xf32>
      %c0 = arith.constant 0 : index
      %c0_3 = arith.constant 0 : index
      %9 = vector.load %arg4[%c0, %c0_3] : memref<6x128xf32, #tpu.memory_space<vmem>>, vector<6x128xf32>
      tpu.vector_store %arg4[%c0, %c0_3], %8 {strides = array<i32>} : memref<6x128xf32, #tpu.memory_space<vmem>>, vector<6x128xf32>,
      %cst_4 = arith.constant 0.000000e+00 : f32
      %10 = vector.broadcast %cst_4 : f32 to vector<6x128xf32>
      %c0_5 = arith.constant 0 : index
      %c0_6 = arith.constant 0 : index
      %11 = vector.load %arg5[%c0_5, %c0_6] : memref<6x128xf32, #tpu.memory_space<vmem>>, vector<6x128xf32>
      tpu.vector_store %arg5[%c0_5, %c0_6], %10 {strides = array<i32>} : memref<6x128xf32, #tpu.memory_space<vmem>>, vector<6x128xf32>,
    } else {
    }
    %c1_i32 = arith.constant 1 : i32
    %3 = arith.muli %arg0, %c1_i32 : i32
    %4 = arith.addi %3, %arg1 : i32
    %c0_i32_1 = arith.constant 0 : i32
    %5 = arith.cmpi eq, %4, %c0_i32_1 : i32
    %6 = arith.extui %5 : i1 to i32
    %c0_i32_2 = arith.constant 0 : i32
    %7 = arith.cmpi ne, %6, %c0_i32_2 : i32
    scf.if %7 {
      %c0 = arith.constant 0 : index
      %c0_3 = arith.constant 0 : index
      %8 = vector.load %arg4[%c0, %c0_3] : memref<6x128xf32, #tpu.memory_space<vmem>>, vector<6x128xf32>
      %c0_4 = arith.constant 0 : index
      %c0_5 = arith.constant 0 : index
      %9 = vector.load %arg5[%c0_4, %c0_5] : memref<6x128xf32, #tpu.memory_space<vmem>>, vector<6x128xf32>
      %c0_6 = arith.constant 0 : index
      %c0_7 = arith.constant 0 : index
      %10 = vector.load %arg2[%c0_6, %c0_7] : memref<6x384xf32, #tpu.memory_space<vmem>>, vector<6x384xf32>
      %c0_8 = arith.constant 0 : index
      %c0_9 = arith.constant 0 : index
      %11 = vector.load %arg3[%c0_8, %c0_9] : memref<6x384xf32, #tpu.memory_space<vmem>>, vector<6x384xf32>
      %cst = arith.constant 5.000000e-01 : f32
      %12 = vector.broadcast %cst : f32 to vector<6x384xf32>
      %13 = arith.mulf %12, %10 : vector<6x384xf32>
      %14 = math.tanh %13 : vector<6x384xf32>
      %cst_10 = arith.constant 1.000000e+00 : f32
      %15 = vector.broadcast %cst_10 : f32 to vector<6x384xf32>
      %16 = arith.addf %14, %15 : vector<6x384xf32>
      %cst_11 = arith.constant 5.000000e-01 : f32
      %17 = vector.broadcast %cst_11 : f32 to vector<6x384xf32>
      %18 = arith.mulf %17, %16 : vector<6x384xf32>
      %19 = arith.mulf %18, %11 : vector<6x384xf32>
      %20 = arith.addf %18, %11 : vector<6x384xf32>
      %21 = tpu.iota {dimensions = array<i32: 1>} : vector<6x384xi32>
      %c312_i32 = arith.constant 312 : i32
      %22 = vector.broadcast %c312_i32 : i32 to vector<6x384xi32>
      %23 = arith.cmpi slt, %21, %22 : vector<6x384xi32>
      %cst_12 = arith.constant 0.000000e+00 : f32
      %24 = vector.broadcast %cst_12 : f32 to vector<6x384xf32>
      %25 = arith.select %23, %19, %24 : vector<6x384xi1>, vector<6x384xf32>
      %cst_13 = arith.constant 0.000000e+00 : f32
      %26 = vector.broadcast %cst_13 : f32 to vector<6x384xf32>
      %27 = arith.select %23, %20, %26 : vector<6x384xi1>, vector<6x384xf32>
      %28 = vector.extract_strided_slice %25 {offsets = [0, 0], sizes = [6, 128], strides = [1, 1]} : vector<6x384xf32> to vector<6x128xf32>
      %29 = arith.addf %8, %28 : vector<6x128xf32>
      %30 = vector.extract_strided_slice %27 {offsets = [0, 0], sizes = [6, 128], strides = [1, 1]} : vector<6x384xf32> to vector<6x128xf32>
      %31 = arith.addf %9, %30 : vector<6x128xf32>
      %32 = vector.extract_strided_slice %25 {offsets = [0, 128], sizes = [6, 128], strides = [1, 1]} : vector<6x384xf32> to vector<6x128xf32>
      %33 = arith.addf %29, %32 : vector<6x128xf32>
      %34 = vector.extract_strided_slice %27 {offsets = [0, 128], sizes = [6, 128], strides = [1, 1]} : vector<6x384xf32> to vector<6x128xf32>
      %35 = arith.addf %31, %34 : vector<6x128xf32>
      %36 = vector.extract_strided_slice %25 {offsets = [0, 256], sizes = [6, 128], strides = [1, 1]} : vector<6x384xf32> to vector<6x128xf32>
      %37 = arith.addf %33, %36 : vector<6x128xf32>
      %38 = vector.extract_strided_slice %27 {offsets = [0, 256], sizes = [6, 128], strides = [1, 1]} : vector<6x384xf32> to vector<6x128xf32>
      %39 = arith.addf %35, %38 : vector<6x128xf32>
      %c0_14 = arith.constant 0 : index
      %c0_15 = arith.constant 0 : index
      %40 = vector.load %arg4[%c0_14, %c0_15] : memref<6x128xf32, #tpu.memory_space<vmem>>, vector<6x128xf32>
      tpu.vector_store %arg4[%c0_14, %c0_15], %37 {strides = array<i32>} : memref<6x128xf32, #tpu.memory_space<vmem>>, vector<6x128xf32>,
      %c0_16 = arith.constant 0 : index
      %c0_17 = arith.constant 0 : index
      %41 = vector.load %arg5[%c0_16, %c0_17] : memref<6x128xf32, #tpu.memory_space<vmem>>, vector<6x128xf32>
      tpu.vector_store %arg5[%c0_16, %c0_17], %39 {strides = array<i32>} : memref<6x128xf32, #tpu.memory_space<vmem>>, vector<6x128xf32>,
    } else {
    }
    return
  }
  func.func @transform_0(%arg0: i32, %arg1: i32) -> (i32, i32) {
    %c1_i32 = arith.constant 1 : i32
    %0 = arith.muli %arg0, %c1_i32 : i32
    %1 = arith.addi %0, %arg1 : i32
    %c0_i32 = arith.constant 0 : i32
    %2 = arith.minsi %1, %c0_i32 : i32
    %c0_i32_0 = arith.constant 0 : i32
    %c0_i32_1 = arith.constant 0 : i32
    return %c0_i32_0, %2 : i32, i32
  }
  func.func @transform_1(%arg0: i32, %arg1: i32) -> (i32, i32) {
    %c1_i32 = arith.constant 1 : i32
    %0 = arith.muli %arg0, %c1_i32 : i32
    %1 = arith.addi %0, %arg1 : i32
    %c0_i32 = arith.constant 0 : i32
    %2 = arith.minsi %1, %c0_i32 : i32
    %c0_i32_0 = arith.constant 0 : i32
    %c0_i32_1 = arith.constant 0 : i32
    return %c0_i32_0, %2 : i32, i32
  }
  func.func @transform_2(%arg0: i32, %arg1: i32) -> (i32, i32) {
    %c0_i32 = arith.constant 0 : i32
    %c0_i32_0 = arith.constant 0 : i32
    return %c0_i32, %arg0 : i32, i32
  }
  func.func @transform_3(%arg0: i32, %arg1: i32) -> (i32, i32) {
    %c0_i32 = arith.constant 0 : i32
    %c0_i32_0 = arith.constant 0 : i32
    return %c0_i32, %arg0 : i32, i32
  }
}

</mosaic_0001>

<bundles_post_ra>
// kernel: dice_loss.1
= control target key start
LH: loop header
LB: loop body
LE: loop exit
PB: predicated region body
PF: predicated region fallthrough
CT: control target
= control target key end

     0   :  { %v162_v0 = vmov 0.0   ;;  %v114_v7 = vlaneseq  ;;  %s219_s2 = inlined_call_operand.vmem [shape: f32[6,128], index: 2, kind: output, shape index: {0}]   ;;  %s220_s3 = inlined_call_operand.vmem [shape: f32[6,128], index: 3, kind: output, shape index: {1}]   ;;  %s221_s0 = inlined_call_operand.vmem [shape: f32[6,312], index: 0, kind: input, shape index: {}]   ;;  %s222_s1 = inlined_call_operand.vmem [shape: f32[6,312], index: 1, kind: input, shape index: {}]  }
   0x1   :  { %81 = vst [vmem:[%s219_s2] sm:$0x3f] %v162_v0  ;;  %82 = vst [vmem:[%s220_s3] sm:$0x3f] %v162_v0  ;;  %v90_v1 = vld [vmem:[%s221_s0] sm:$0x3f]  ;;  %v91_v2 = vld [vmem:[%s221_s0 + $0x8] sm:$0x3f] }
   0x2   :  { %v92_v3 = vld [vmem:[%s221_s0 + $0x10] sm:$0x3f]  ;;  %v96_v4 = vmul.f32 0.5, %v90_v1  ;;  %v97_v5 = vmul.f32 0.5, %v91_v2  ;;  %v115_v8 = vand.u32 127, %v114_v7 }
   0x3   :  { %v98_v6 = vmul.f32 0.5, %v92_v3  ;;  %v93_v13 = vld [vmem:[%s222_s1] sm:$0x3f]  ;;  %v94_v16 = vld [vmem:[%s222_s1 + $0x8] sm:$0x3f] }
   0x4   :  { %156 = vtanh.f32 %v96_v4  ;;  %v117_v15 = vadd.s32 256, %v115_v8  ;;  %v95_v17 = vld [vmem:[%s222_s1 + $0x10] sm:$0x3f] }
   0x5   :  { %158 = vtanh.f32 %v97_v5 }
   0x6   :  { %160 = vtanh.f32 %v98_v6  ;;  %vm120_vm0 = vcmp.lt.s32.totalorder %v117_v15, 312 }
   0x8   :  { %v88_v20 = vld [vmem:[%s219_s2] sm:$0x3f] }
   0x9   :  { %v89_v22 = vld [vmem:[%s220_s3] sm:$0x3f] }
   0xe   :  { %v157_v9 = vpop.eup %156 }
   0xf   :  { %v159_v10 = vpop.eup %158  ;;  %v102_v11 = vadd.f32 1.0, %v157_v9 }
  0x10   :  { %v161_v12 = vpop.eup %160  ;;  %v103_v14 = vadd.f32 1.0, %v159_v10 }
  0x11   :  { %v104_v18 = vadd.f32 1.0, %v161_v12  ;;  %v105_v19 = vmul.f32 0.5, %v102_v11 }
  0x12   :  { %v106_v21 = vmul.f32 0.5, %v103_v14 }
  0x13   :  { %v107_v23 = vmul.f32 0.5, %v104_v18  ;;  %v108_v24 = vmul.f32 %v105_v19, %v93_v13  ;;  %v111_v25 = vadd.f32 %v105_v19, %v93_v13 }
  0x14   :  { %v109_v26 = vmul.f32 %v106_v21, %v94_v16  ;;  %v112_v27 = vadd.f32 %v106_v21, %v94_v16 }
  0x15   :  { %v110_v28 = vmul.f32 %v107_v23, %v95_v17  ;;  %v127_v29 = vadd.f32 %v108_v24, %v88_v20  ;;  %v113_v30 = vadd.f32 %v107_v23, %v95_v17  ;;  %v128_v31 = vadd.f32 %v111_v25, %v89_v22 }
  0x17   :  { %v123_v32 = vsel %vm120_vm0, %v110_v28, 0.0  ;;  %v129_v33 = vadd.f32 %v127_v29, %v109_v26  ;;  %v126_v34 = vsel %vm120_vm0, %v113_v30, 0.0  ;;  %v130_v35 = vadd.f32 %v128_v31, %v112_v27 }
  0x19   :  { %v131_v36 = vadd.f32 %v129_v33, %v123_v32  ;;  %v132_v37 = vadd.f32 %v130_v35, %v126_v34 }
  0x1b   :  { %133 = vst [vmem:[%s219_s2] sm:$0x3f] %v131_v36  ;;  %134 = vst [vmem:[%s220_s3] sm:$0x3f] %v132_v37 }

</bundles_post_ra>
